<compile_context>
chip_gen: v5e
topology: v5e:2x2
jax: 0.10.0
libtpu: 0.0.40
codegen_flags: <defaults>
</compile_context>

<pallas_src>
import functools

import jax
import jax.numpy as jnp
from jax.experimental import pallas as pl
from jax.experimental.pallas import tpu as pltpu

TAU_M = 20.0
V_THRESHOLD = -55.0
V_RESET = -70.0

_LANE = 128
_MAX_LANE_WIDTH = 2048
_TARGET_TILE_BYTES = 4 * 1024 * 1024  # ~4 MiB/operand/step (3 ops x 2 bufs = 24 MiB)


# ----------------------------------------------------------------------------- kernels
def _lif_kernel(x_ref, s_ref, v_ref):
    x = x_ref[...].astype(jnp.float32)
    s = s_ref[...].astype(jnp.float32)
    dv = (x - s) / TAU_M          # keep the exact PyTorch form (bit-faithful spiking)
    v = s + dv
    v_ref[...] = jnp.where(v >= V_THRESHOLD, V_RESET, v).astype(v_ref.dtype)


def _lif_kernel_zero_state(x_ref, v_ref):
    # s == 0  =>  v = x / tau
    v = x_ref[...].astype(jnp.float32) / TAU_M
    v_ref[...] = jnp.where(v >= V_THRESHOLD, V_RESET, v).astype(v_ref.dtype)


# ----------------------------------------------------------------------------- layout
def _round_up(a, b):
    return (a + b - 1) // b * b


@functools.lru_cache(maxsize=None)
def _vmem_limit_bytes():
    """Scoped-VMEM limit with per-generation headroom (v7x: 64 MiB physical)."""
    phys = 128 * 1024 * 1024
    try:
        info = pltpu.get_tpu_info()
        phys = int(getattr(info, "vmem_capacity_bytes", phys) or phys)
    except Exception:
        pass
    return min(48 * 1024 * 1024, max(16 * 1024 * 1024, phys // 2))


def _sublane(itemsize):
    # Sub-32-bit dtypes pack along sublanes: f32 -> 8, bf16 -> 16, int8/fp8 -> 32.
    return 8 * max(1, 4 // max(1, itemsize))


def _choose_layout(n, itemsize, n_operands):
    """Pick (padded_len, width, rows, row_tile) for a flat buffer of n elements."""
    # Pad only when n is not a multiple of 128 (never the case for conv features).
    n_pad = _round_up(n, _LANE)

    # Widest lane-dense width that needs no extra padding -> unmasked vst, fat DMAs.
    width = _LANE
    for w in (_MAX_LANE_WIDTH, 1024, 512, 256, _LANE):
        if n_pad % w == 0:
            width = w
            break
    rows = n_pad // width

    sub = _sublane(itemsize)
    # Each operand (inputs + output) is double-buffered; keep headroom under the limit.
    tile_bytes = min(_TARGET_TILE_BYTES, _vmem_limit_bytes() // (2 * n_operands))
    target_rows = max(sub, tile_bytes // (width * itemsize) // sub * sub)

    if rows <= target_rows:
        if rows < 2 * sub:
            # Tiny input: one block equal to the full array dims (always legal).
            return n_pad, width, rows, rows
        # Medium input: force >=2 grid steps so both v7x TensorCores participate.
        return n_pad, width, rows, _round_up(pl.cdiv(rows, 2), sub)

    row_tile = target_rows
    steps = pl.cdiv(rows, row_tile)
    if steps > 1 and steps % 2 == 1:
        # Prefer an even step count so neither TensorCore idles on the tail.
        row_tile = max(sub, _round_up(pl.cdiv(rows, steps + 1), sub))
    return n_pad, width, rows, row_tile


# ----------------------------------------------------------------------------- driver
def _run_lif(kernel, args, rows, width, row_tile, dtype, alias_state):
    grid = (pl.cdiv(rows, row_tile),)               # ragged tail handled by masking
    block = pl.BlockSpec((row_tile, width), lambda i: (i, 0))
    itemsize = jnp.dtype(dtype).itemsize
    n = rows * width
    cost = pl.CostEstimate(
        flops=3 * n,
        transcendentals=0,
        bytes_accessed=(len(args) + 1) * n * itemsize,
    )
    # Alias the (dead-after-call) previous state buffer to the output.
    io_alias = {len(args) - 1: 0} if alias_state else {}
    return pl.pallas_call(
        kernel,
        out_shape=jax.ShapeDtypeStruct((rows, width), dtype),
        grid_spec=pltpu.PrefetchScalarGridSpec(
            num_scalar_prefetch=0,
            grid=grid,
            in_specs=[block] * len(args),
            out_specs=block,
        ),
        compiler_params=pltpu.CompilerParams(
            dimension_semantics=("parallel",),
            vmem_limit_bytes=_vmem_limit_bytes(),
        ),
        cost_estimate=cost,
        input_output_aliases=io_alias,
    )(*args)


def lif_cell(x, s=None):
    """Pallas LIF cell. x: any-shape float array (e.g. NCHW). Returns (v, v)."""
    orig_shape = x.shape
    dtype = x.dtype
    itemsize = jnp.dtype(dtype).itemsize
    n = x.size
    n_operands = 2 if s is None else 3              # inputs + output
    n_pad, width, rows, row_tile = _choose_layout(n, itemsize, n_operands)

    def to_slab(a):
        a = a.reshape(-1)
        if n_pad != n:
            a = jnp.pad(a, (0, n_pad - n))
        return a.reshape(rows, width)

    xf = to_slab(x)
    if s is None:
        # Zero-state path: one input stream instead of two.
        vf = _run_lif(_lif_kernel_zero_state, (xf,), rows, width, row_tile, dtype,
                      alias_state=False)
    else:
        sf = to_slab(s.astype(dtype))
        vf = _run_lif(_lif_kernel, (xf, sf), rows, width, row_tile, dtype,
                      alias_state=True)

    v = vf.reshape(-1)
    if n_pad != n:
        v = v[:n]   # drop the padded tail (keep this slice if layout logic changes)
    return (v.reshape(orig_shape),) * 2


# ----------------------------------------------------------------------------- reference
def lif_reference(x, s=None):
    """Pure-JAX reference matching the PyTorch module."""
    if s is None:
        s = jnp.zeros_like(x)
    dv = (x - s) / TAU_M
    v = s + dv
    spikes = (v >= V_THRESHOLD).astype(v.dtype)
    v = (1.0 - spikes) * v + spikes * V_RESET
    return (v, v)


if __name__ == "__main__":
    key = jax.random.PRNGKey(0)
    kx, ks, kx2, ks2 = jax.random.split(key, 4)

    # Case 1: small NCHW conv-feature shape, state provided.
    B, C, H, W = 2, 4, 16, 16
    x = jax.random.uniform(kx, (B, C, H, W), jnp.float32, minval=-80.0, maxval=-30.0)
    s = jax.random.uniform(ks, (B, C, H, W), jnp.float32, minval=-80.0, maxval=-30.0)
    v1, v1b = lif_cell(x, s)
    jax.block_until_ready(v1)
    r1, _ = lif_reference(x, s)
    assert jnp.allclose(v1, r1, atol=1e-5, rtol=1e-5), "mismatch (s provided)"
    assert jnp.allclose(v1, v1b), "outputs must be identical"

    # Case 2: s is None (zero init, like the PyTorch branch) -> single-input kernel.
    v2, _ = lif_cell(x, None)
    jax.block_until_ready(v2)
    r2, _ = lif_reference(x, None)
    assert jnp.allclose(v2, r2, atol=1e-5, rtol=1e-5), "mismatch (s None)"

    # Case 3: larger shape exercising the multi-step tiled grid path (>=2 steps).
    B2, C2, H2, W2 = 4, 16, 64, 64   # 256K elements -> (128, 2048) slab, 2 grid steps
    x3 = jax.random.uniform(kx2, (B2, C2, H2, W2), jnp.float32, minval=-80.0, maxval=-30.0)
    s3 = jax.random.uniform(ks2, (B2, C2, H2, W2), jnp.float32, minval=-80.0, maxval=-30.0)
    v3, _ = lif_cell(x3, s3)
    jax.block_until_ready(v3)
    r3, _ = lif_reference(x3, s3)
    assert jnp.allclose(v3, r3, atol=1e-5, rtol=1e-5), "mismatch (tiled path)"

    # Case 4: bf16 I/O (half the HBM bytes); kernel computes in f32 internally, so
    # compare against the f32 reference cast back to bf16.
    xb = x.astype(jnp.bfloat16)
    sb = s.astype(jnp.bfloat16)
    v4, _ = lif_cell(xb, sb)
    jax.block_until_ready(v4)
    r4, _ = lif_reference(xb.astype(jnp.float32), sb.astype(jnp.float32))
    r4 = r4.astype(jnp.bfloat16)
    assert v4.dtype == jnp.bfloat16
    assert jnp.allclose(v4.astype(jnp.float32), r4.astype(jnp.float32),
                        atol=1e-2, rtol=1e-2), "mismatch (bf16 path)"

    print("KERNEL_OK")
</pallas_src>

<mosaic_0001>
module attributes {stable_mosaic.version = 11 : i64} {
  func.func @_lif_kernel(%arg0: i32, %arg1: memref<1x2048xf32, #tpu.memory_space<vmem>>, %arg2: memref<1x2048xf32, #tpu.memory_space<vmem>>, %arg3: memref<1x2048xf32, #tpu.memory_space<vmem>>) attributes {dimension_semantics = [#tpu.dimension_semantics<parallel>], iteration_bounds = array<i64: 1>, scalar_prefetch = 0 : i64, scratch_operands = 0 : i64, tpu.core_type = #tpu.core_type<tc>, window_params = [{transform_indices = @transform_0, window_bounds = array<i64: 1, 2048>}, {transform_indices = @transform_1, window_bounds = array<i64: 1, 2048>}, {transform_indices = @transform_2, window_bounds = array<i64: 1, 2048>}]} {
    %c0 = arith.constant 0 : index
    %c0_0 = arith.constant 0 : index
    %0 = vector.load %arg1[%c0, %c0_0] : memref<1x2048xf32, #tpu.memory_space<vmem>>, vector<1x2048xf32>
    %c0_1 = arith.constant 0 : index
    %c0_2 = arith.constant 0 : index
    %1 = vector.load %arg2[%c0_1, %c0_2] : memref<1x2048xf32, #tpu.memory_space<vmem>>, vector<1x2048xf32>
    %2 = arith.subf %0, %1 : vector<1x2048xf32>
    %cst = arith.constant 2.000000e+01 : f32
    %3 = vector.broadcast %cst : f32 to vector<1x2048xf32>
    %4 = arith.divf %2, %3 : vector<1x2048xf32>
    %5 = arith.addf %1, %4 : vector<1x2048xf32>
    %cst_3 = arith.constant -5.500000e+01 : f32
    %6 = vector.broadcast %cst_3 : f32 to vector<1x2048xf32>
    %7 = arith.cmpf oge, %5, %6 : vector<1x2048xf32>
    %cst_4 = arith.constant -7.000000e+01 : f32
    %8 = vector.broadcast %cst_4 : f32 to vector<1x2048xf32>
    %9 = arith.select %7, %8, %5 : vector<1x2048xi1>, vector<1x2048xf32>
    %c0_5 = arith.constant 0 : index
    %c0_6 = arith.constant 0 : index
    %10 = vector.load %arg3[%c0_5, %c0_6] : memref<1x2048xf32, #tpu.memory_space<vmem>>, vector<1x2048xf32>
    tpu.vector_store %arg3[%c0_5, %c0_6], %9 {strides = array<i32>} : memref<1x2048xf32, #tpu.memory_space<vmem>>, vector<1x2048xf32>,
    return
  }
  func.func @transform_0(%arg0: i32) -> (i32, i32) {
    %c0_i32 = arith.constant 0 : i32
    %c0_i32_0 = arith.constant 0 : i32
    return %arg0, %c0_i32 : i32, i32
  }
  func.func @transform_1(%arg0: i32) -> (i32, i32) {
    %c0_i32 = arith.constant 0 : i32
    %c0_i32_0 = arith.constant 0 : i32
    return %arg0, %c0_i32 : i32, i32
  }
  func.func @transform_2(%arg0: i32) -> (i32, i32) {
    %c0_i32 = arith.constant 0 : i32
    %c0_i32_0 = arith.constant 0 : i32
    return %arg0, %c0_i32 : i32, i32
  }
}

</mosaic_0001>

<bundles_post_ra>
// kernel: tpu_custom_call.1
= control target key start
LH: loop header
LB: loop body
LE: loop exit
PB: predicated region body
PF: predicated region fallthrough
CT: control target
= control target key end

     0   :  { %7 = vsyncpa [#allocation3], 0  ;;  %s153_s0 = inlined_call_operand.vmem [shape: f32[1,2048], index: 0, kind: input, shape index: {}]   ;;  %s154_s1 = inlined_call_operand.hbm [shape: f32[1,2048], index: 1, kind: input, shape index: {}, may-alias: {1,2}]   ;;  %s155_s2 = inlined_call_operand.hbm [shape: f32[1,2048], index: 2, kind: output, shape index: {}, may-alias: {1,2}]  }
   0x1   :  { %8 = vsyncpa [#allocation4], 0  ;;  %s16_s11 = sshll.u32 %s154_s1, 4  ;;  %s123_s12 = smov [#allocation2]   ;;  %s17_s11 = int_to_ptr.hbm [resolvable:$true] %s16_s11 }
   0x2   :  { %s18_s13 = sshll.u32 %s123_s12, 4  ;;  %s19_s13 = int_to_ptr.vmem [resolvable:$true] %s18_s13 }
   0x3   :  { %21 = dma.hbm_to_vmem [thread:$0]  %s17_s11, 256, %s19_s13, [#allocation3]  }
   0x4   :  { %119 = dma.done.wait [#allocation3], 256  }
   0x5   :  { %120 = vsyncadd [#allocation3], 4294967040  ;;  %v124_v0 = vmov 20.0   ;;  %v26_v3 = vld [vmem:[%s153_s0] sm:$0xff]  ;;  %v27_v6 = vld [vmem:[%s153_s0 + $0x8] sm:$0xff]  ;;  %s125_s1 = smov [#allocation5]  }
   0x6   :  { %69 = vrcp.f32 %v124_v0  ;;  %v28_v4 = vld [vmem:[#allocation2] sm:$0xff]  ;;  %v29_v7 = vld [vmem:[#allocation2 + $0x8] sm:$0xff]  ;;  %s54_s18 = sshll.u32 %s125_s1, 4  ;;  %s56_s21 = sshll.u32 %s155_s2, 4  ;;  %s55_s18 = int_to_ptr.vmem [resolvable:$true] %s54_s18  ;;  %s57_s21 = int_to_ptr.hbm [resolvable:$true] %s56_s21 }
   0x7   :  { %v30_v9 = vsub.f32 %v26_v3, %v28_v4  ;;  %v31_v10 = vsub.f32 %v27_v6, %v29_v7 }
   0xc   :  { %v70_v1 = vpop.eup %69 }
   0xd   :  { %v33_v2 = vmul.f32 20.0, %v70_v1  ;;  %vm37_vm0 = vweird.f32 %v70_v1 }
   0xf   :  { %v34_v5 = vsub.f32 1.0, %v33_v2 }
  0x11   :  { %v35_v8 = vmul.f32 %v70_v1, %v34_v5 }
  0x13   :  { %v36_v11 = vadd.f32 %v70_v1, %v35_v8 }
  0x15   :  { %v38_v12 = vsel %vm37_vm0, %v70_v1, %v36_v11 }
  0x16   :  { %v39_v13 = vmul.f32 %v38_v12, %v30_v9  ;;  %v40_v14 = vmul.f32 %v38_v12, %v31_v10 }
  0x18   :  { %v41_v15 = vadd.f32 %v39_v13, %v28_v4  ;;  %v42_v16 = vadd.f32 %v40_v14, %v29_v7 }
  0x1a   :  { %vm43_vm1 = vcmp.ge.f32.partialorder %v41_v15, -55.0  ;;  %vm44_vm2 = vcmp.ge.f32.partialorder %v42_v16, -55.0 }
  0x1b   :  { %v45_v17 = vsel %vm43_vm1, -70.0, %v41_v15  ;;  %v46_v18 = vsel %vm44_vm2, -70.0, %v42_v16 }
  0x1c   :  { %47 = vst [vmem:[#allocation5] sm:$0xff] %v45_v17 }
  0x1d   :  { %48 = vst [vmem:[#allocation5 + $0x8] sm:$0xff] %v46_v18 }
  0x1e   :  { %59 = dma.vmem_to_hbm [thread:$0]  %s55_s18, 256, %s57_s21, [#allocation4]  }
  0x1f   :  { %121 = dma.done.wait [#allocation4], 256  }
  0x20   :  { %122 = vsyncadd [#allocation4], 4294967040 }
  0x21   :  { %64 = vsyncpa [#allocation3], 1 }
  0x22   :  { %65 = vsyncpa [#allocation4], 1 }

</bundles_post_ra>
